<compile_context>
chip_gen: v5e
topology: v5e:2x2
jax: 0.10.0
libtpu: 0.0.40
codegen_flags: <defaults>
</compile_context>

<pallas_src>
import math

import jax
import jax.numpy as jnp
import numpy as np
from jax import lax
from jax.experimental import pallas as pl
from jax.experimental.pallas import tpu as pltpu

VOCAB_PAD = 32                      # max(13, 32, 7, 24) -> every feature padded to 32 rows
NUM_FEATS = 4                       # month, day, weekday, hour  (freq='h')
K_BAND = NUM_FEATS * VOCAB_PAD      # 128 rows per group band


# ---------------------------------------------------------------------------
# Parameter construction (deterministic, mirrors FixedEmbedding.__init__)
# ---------------------------------------------------------------------------
def fixed_embedding_table(c_in: int, d_model: int) -> np.ndarray:
    w = np.zeros((c_in, d_model), dtype=np.float32)
    position = np.arange(0, c_in, dtype=np.float32)[:, None]
    div_term = np.exp(
        np.arange(0, d_model, 2, dtype=np.float32) * -(math.log(10000.0) / d_model)
    )
    w[:, 0::2] = np.sin(position * div_term)
    w[:, 1::2] = np.cos(position * div_term)
    return w


def build_temporal_tables(d_model: int, freq: str = "h"):
    # freq='h' -> hour_size=24; weekday=7; day=32; month=13  (no minute/second)
    assert freq == "h", "only freq='h' implemented in this synthetic kernel"
    hour_size, weekday_size, day_size, month_size = 24, 7, 32, 13
    sizes = [month_size, day_size, weekday_size, hour_size]   # feature order 0..3
    tables = np.zeros((NUM_FEATS, VOCAB_PAD, d_model), dtype=np.float32)
    for f, c_in in enumerate(sizes):
        tables[f, :c_in, :] = fixed_embedding_table(c_in, d_model)
    return jnp.asarray(tables), sizes


# ---------------------------------------------------------------------------
# Pallas kernel: fused embedding lookup as ONE one-hot matmul per row tile.
# ---------------------------------------------------------------------------
def temporal_embed_kernel(idx_ref, tab_ref, out_ref):
    # idx_ref: (TN, g*4) int32, feature offsets (f*32) pre-added in the wrapper.
    # tab_ref: (g*128, g*d) f32, block-diagonal when g > 1 (stays VMEM-resident).
    # out_ref: (TN, g*d)  f32, lane-dense when g*d is a multiple of 128.
    tn = out_ref.shape[0]
    g = idx_ref.shape[1] // NUM_FEATS

    # One shared (TN, 128) lane iota; each group's band is only 128 wide.
    lane = lax.broadcasted_iota(jnp.int32, (tn, K_BAND), 1)

    pieces = []
    for j in range(g):                                 # unrolled (g is static)
        oh = None
        for f in range(NUM_FEATS):                     # unrolled (4 iters)
            c = j * NUM_FEATS + f
            col = idx_ref[:, c:c + 1]                  # narrow (TN,1) slice, short live range
            m = lane == col                            # (TN, 128) bool
            oh = m if oh is None else (oh | m)
        pieces.append(oh)
    # Concatenation along lane-tile boundaries is free layout-wise; the
    # block-diagonal table then places group j's embeddings into columns
    # [j*d, (j+1)*d) of the lane-dense output.
    onehot = pieces[0] if g == 1 else jnp.concatenate(pieces, axis=1)

    out_ref[...] = jnp.dot(onehot.astype(jnp.float32), tab_ref[...],
                           preferred_element_type=jnp.float32)


# ---------------------------------------------------------------------------
# Wrapper: layout plumbing + VMEM-aware tiling.
# ---------------------------------------------------------------------------
def _vmem_capacity_bytes() -> int:
    try:
        cap = getattr(pltpu.get_tpu_info(), "vmem_capacity_bytes", None)
        if cap:
            return int(cap)
    except Exception:
        pass
    return 64 << 20                                   # conservative fallback (v7x)


def _vmem_estimate(tn: int, dg: int, ncols: int, k: int) -> int:
    out_b = 2 * tn * dg * 4                           # double-buffered output block
    idx_b = 2 * tn * ncols * 4                        # double-buffered index block
    tab_b = 2 * k * dg * 4                            # table (constant index_map)
    tmp_b = tn * k * 5 + tn * K_BAND * 4              # one-hot (f32 + mask) + lane iota
    return out_b + idx_b + tab_b + tmp_b


def temporal_embedding(x_mark, tables, d_model: int):
    """x_mark: (B, S, 4) integer-valued array. tables: (4, 32, D). -> (B, S, D) f32."""
    b, s, nfeat = x_mark.shape
    assert nfeat == NUM_FEATS
    n = b * s
    d = d_model

    nfeat_t, v, d_t = tables.shape
    assert nfeat_t == NUM_FEATS and v == VOCAB_PAD and d_t == d

    # ---- lane folding: group g consecutive rows so the output last dim is 128 ----
    if d >= 128 or (128 % d) != 0 or (n % (128 // d)) != 0:
        g = 1
    else:
        g = 128 // d
    dg = g * d                                        # output lane width
    k = g * K_BAND                                    # contraction depth
    ncols = g * NUM_FEATS                             # index columns per output row
    n_rows = n // g                                   # output rows

    # Flat (possibly block-diagonal) table; for g == 1 this is just (128, d).
    tab = tables.reshape(K_BAND, d)
    tab_flat = jnp.kron(jnp.eye(g, dtype=jnp.float32), tab)          # (k, dg)

    # Indices: clamp (guards aliasing across feature bands), add f*32 band offsets,
    # fold g logical rows per output row.
    idx = jnp.clip(x_mark.astype(jnp.int32).reshape(n, NUM_FEATS), 0, VOCAB_PAD - 1)
    feat_off = jnp.arange(NUM_FEATS, dtype=jnp.int32) * VOCAB_PAD    # (4,)
    idx_rows = idx.reshape(n_rows, ncols) + jnp.tile(feat_off, g)[None, :]

    # ---- VMEM-aware row tile ----
    TGT_OUT_BYTES = 4 << 20                           # ~4 MiB output block target
    vmem_cap = _vmem_capacity_bytes()                 # 128 MiB v5e/v6e, 64 MiB v7x
    vmem_budget = int(vmem_cap * 0.4)                 # headroom for compiler temps

    tn = max(8, TGT_OUT_BYTES // (dg * 4))
    while tn > 8 and _vmem_estimate(tn, dg, ncols, k) > vmem_budget:
        tn //= 2
    # Keep >= 2 grid steps when there is enough work so v7x megacore can shard
    # rows (neutral on single-TC v5e/v6e).
    if n_rows >= 16:
        tn = min(tn, ((pl.cdiv(n_rows, 2) + 7) // 8) * 8)
    tn = max(8, (tn // 8) * 8)
    if tn >= n_rows:
        tn = n_rows                                   # single block == full dim (legal)

    grid = (pl.cdiv(n_rows, tn),)
    # No input padding / output slicing: the partial last block (if any) is masked
    # by Pallas — its garbage idx rows are computed but never written back.

    est = _vmem_estimate(tn, dg, ncols, k)
    vmem_limit = max(16 << 20, min(vmem_cap - (4 << 20), max(2 * est, 32 << 20)))

    cost = pl.CostEstimate(
        flops=2 * grid[0] * tn * k * dg,
        transcendentals=0,
        bytes_accessed=n_rows * (ncols * 4 + dg * 4) + k * dg * 4,
    )

    out_rows = pl.pallas_call(
        temporal_embed_kernel,
        out_shape=jax.ShapeDtypeStruct((n_rows, dg), jnp.float32),
        grid=grid,
        in_specs=[
            pl.BlockSpec((tn, ncols), lambda i: (i, 0)),     # row tile of indices
            pl.BlockSpec((k, dg), lambda i: (0, 0)),         # table stays resident
        ],
        out_specs=pl.BlockSpec((tn, dg), lambda i: (i, 0)),  # lane-dense when folded
        compiler_params=pltpu.CompilerParams(
            dimension_semantics=("parallel",),
            vmem_limit_bytes=int(vmem_limit),
        ),
        cost_estimate=cost,
    )(idx_rows, tab_flat)

    # (n_rows, g*d) -> (n, d) is a contiguous row-major view -> free reshape.
    return out_rows.reshape(b, s, d)


# ---------------------------------------------------------------------------
# Pure-JAX reference (matches PyTorch forward semantics)
# ---------------------------------------------------------------------------
def temporal_embedding_ref(x_mark, tables):
    x = x_mark.astype(jnp.int32)
    month_x = jnp.take(tables[0], x[:, :, 0], axis=0)
    day_x = jnp.take(tables[1], x[:, :, 1], axis=0)
    weekday_x = jnp.take(tables[2], x[:, :, 2], axis=0)
    hour_x = jnp.take(tables[3], x[:, :, 3], axis=0)
    return hour_x + weekday_x + day_x + month_x


def _make_marks(key, b, s, sizes):
    keys = jax.random.split(key, NUM_FEATS)
    feats = [jax.random.randint(keys[f], (b, s), 0, sizes[f], dtype=jnp.int32)
             for f in range(NUM_FEATS)]
    # The PyTorch module receives float time marks and calls x.long().
    return jnp.stack(feats, axis=-1).astype(jnp.float32)


if __name__ == "__main__":
    key = jax.random.PRNGKey(0)

    # Case 1: small d_model (32) -> exercises the g=4 lane-folded path.
    B, S, D = 2, 8, 32
    tables, sizes = build_temporal_tables(D, freq="h")        # sizes = [13, 32, 7, 24]
    x_mark = _make_marks(key, B, S, sizes)
    out = jax.block_until_ready(temporal_embedding(x_mark, tables, D))
    ref = temporal_embedding_ref(x_mark, tables)
    assert out.shape == (B, S, D) and out.dtype == jnp.float32
    np.testing.assert_allclose(np.asarray(out), np.asarray(ref), rtol=1e-6, atol=1e-6)

    # Case 2: d_model=128 (g=1 path) with a ragged row count -> exercises the
    # masked partial last block (no padding, no post-slice).
    B2, S2, D2 = 3, 7, 128
    tables2, sizes2 = build_temporal_tables(D2, freq="h")
    x_mark2 = _make_marks(jax.random.PRNGKey(1), B2, S2, sizes2)
    out2 = jax.block_until_ready(temporal_embedding(x_mark2, tables2, D2))
    ref2 = temporal_embedding_ref(x_mark2, tables2)
    np.testing.assert_allclose(np.asarray(out2), np.asarray(ref2), rtol=1e-6, atol=1e-6)

    print("KERNEL_OK")
</pallas_src>

<mosaic_0001>
module attributes {stable_mosaic.version = 11 : i64} {
  func.func @temporal_embed_kernel(%arg0: i32, %arg1: memref<4x16xi32, #tpu.memory_space<vmem>>, %arg2: memref<512x128xf32, #tpu.memory_space<vmem>>, %arg3: memref<4x128xf32, #tpu.memory_space<vmem>>) attributes {dimension_semantics = [#tpu.dimension_semantics<parallel>], iteration_bounds = array<i64: 1>, scalar_prefetch = 0 : i64, scratch_operands = 0 : i64, tpu.core_type = #tpu.core_type<tc>, window_params = [{transform_indices = @transform_0, window_bounds = array<i64: 4, 16>}, {pipeline_mode = #tpu.pipeline_mode<synchronous>, transform_indices = @transform_1, window_bounds = array<i64: 512, 128>}, {transform_indices = @transform_2, window_bounds = array<i64: 4, 128>}]} {
    %0 = tpu.iota {dimensions = array<i32: 1>} : vector<4x128xi32>
    %c0 = arith.constant 0 : index
    %c0_0 = arith.constant 0 : index
    %1 = vector.load %arg1[%c0, %c0_0] : memref<4x16xi32, #tpu.memory_space<vmem>>, vector<4x1xi32>
    %2 = vector.broadcast %1 : vector<4x1xi32> to vector<4x128xi32>
    %3 = arith.cmpi eq, %0, %2 : vector<4x128xi32>
    %c0_1 = arith.constant 0 : index
    %c1 = arith.constant 1 : index
    %4 = vector.load %arg1[%c0_1, %c1] : memref<4x16xi32, #tpu.memory_space<vmem>>, vector<4x1xi32>
    %5 = vector.broadcast %4 : vector<4x1xi32> to vector<4x128xi32>
    %6 = arith.cmpi eq, %0, %5 : vector<4x128xi32>
    %7 = arith.ori %3, %6 : vector<4x128xi1>
    %c0_2 = arith.constant 0 : index
    %c2 = arith.constant 2 : index
    %8 = vector.load %arg1[%c0_2, %c2] : memref<4x16xi32, #tpu.memory_space<vmem>>, vector<4x1xi32>
    %9 = vector.broadcast %8 : vector<4x1xi32> to vector<4x128xi32>
    %10 = arith.cmpi eq, %0, %9 : vector<4x128xi32>
    %11 = arith.ori %7, %10 : vector<4x128xi1>
    %c0_3 = arith.constant 0 : index
    %c3 = arith.constant 3 : index
    %12 = vector.load %arg1[%c0_3, %c3] : memref<4x16xi32, #tpu.memory_space<vmem>>, vector<4x1xi32>
    %13 = vector.broadcast %12 : vector<4x1xi32> to vector<4x128xi32>
    %14 = arith.cmpi eq, %0, %13 : vector<4x128xi32>
    %15 = arith.ori %11, %14 : vector<4x128xi1>
    %c0_4 = arith.constant 0 : index
    %c4 = arith.constant 4 : index
    %16 = vector.load %arg1[%c0_4, %c4] : memref<4x16xi32, #tpu.memory_space<vmem>>, vector<4x1xi32>
    %17 = vector.broadcast %16 : vector<4x1xi32> to vector<4x128xi32>
    %18 = arith.cmpi eq, %0, %17 : vector<4x128xi32>
    %c0_5 = arith.constant 0 : index
    %c5 = arith.constant 5 : index
    %19 = vector.load %arg1[%c0_5, %c5] : memref<4x16xi32, #tpu.memory_space<vmem>>, vector<4x1xi32>
    %20 = vector.broadcast %19 : vector<4x1xi32> to vector<4x128xi32>
    %21 = arith.cmpi eq, %0, %20 : vector<4x128xi32>
    %22 = arith.ori %18, %21 : vector<4x128xi1>
    %c0_6 = arith.constant 0 : index
    %c6 = arith.constant 6 : index
    %23 = vector.load %arg1[%c0_6, %c6] : memref<4x16xi32, #tpu.memory_space<vmem>>, vector<4x1xi32>
    %24 = vector.broadcast %23 : vector<4x1xi32> to vector<4x128xi32>
    %25 = arith.cmpi eq, %0, %24 : vector<4x128xi32>
    %26 = arith.ori %22, %25 : vector<4x128xi1>
    %c0_7 = arith.constant 0 : index
    %c7 = arith.constant 7 : index
    %27 = vector.load %arg1[%c0_7, %c7] : memref<4x16xi32, #tpu.memory_space<vmem>>, vector<4x1xi32>
    %28 = vector.broadcast %27 : vector<4x1xi32> to vector<4x128xi32>
    %29 = arith.cmpi eq, %0, %28 : vector<4x128xi32>
    %30 = arith.ori %26, %29 : vector<4x128xi1>
    %c0_8 = arith.constant 0 : index
    %c8 = arith.constant 8 : index
    %31 = vector.load %arg1[%c0_8, %c8] : memref<4x16xi32, #tpu.memory_space<vmem>>, vector<4x1xi32>
    %32 = vector.broadcast %31 : vector<4x1xi32> to vector<4x128xi32>
    %33 = arith.cmpi eq, %0, %32 : vector<4x128xi32>
    %c0_9 = arith.constant 0 : index
    %c9 = arith.constant 9 : index
    %34 = vector.load %arg1[%c0_9, %c9] : memref<4x16xi32, #tpu.memory_space<vmem>>, vector<4x1xi32>
    %35 = vector.broadcast %34 : vector<4x1xi32> to vector<4x128xi32>
    %36 = arith.cmpi eq, %0, %35 : vector<4x128xi32>
    %37 = arith.ori %33, %36 : vector<4x128xi1>
    %c0_10 = arith.constant 0 : index
    %c10 = arith.constant 10 : index
    %38 = vector.load %arg1[%c0_10, %c10] : memref<4x16xi32, #tpu.memory_space<vmem>>, vector<4x1xi32>
    %39 = vector.broadcast %38 : vector<4x1xi32> to vector<4x128xi32>
    %40 = arith.cmpi eq, %0, %39 : vector<4x128xi32>
    %41 = arith.ori %37, %40 : vector<4x128xi1>
    %c0_11 = arith.constant 0 : index
    %c11 = arith.constant 11 : index
    %42 = vector.load %arg1[%c0_11, %c11] : memref<4x16xi32, #tpu.memory_space<vmem>>, vector<4x1xi32>
    %43 = vector.broadcast %42 : vector<4x1xi32> to vector<4x128xi32>
    %44 = arith.cmpi eq, %0, %43 : vector<4x128xi32>
    %45 = arith.ori %41, %44 : vector<4x128xi1>
    %c0_12 = arith.constant 0 : index
    %c12 = arith.constant 12 : index
    %46 = vector.load %arg1[%c0_12, %c12] : memref<4x16xi32, #tpu.memory_space<vmem>>, vector<4x1xi32>
    %47 = vector.broadcast %46 : vector<4x1xi32> to vector<4x128xi32>
    %48 = arith.cmpi eq, %0, %47 : vector<4x128xi32>
    %c0_13 = arith.constant 0 : index
    %c13 = arith.constant 13 : index
    %49 = vector.load %arg1[%c0_13, %c13] : memref<4x16xi32, #tpu.memory_space<vmem>>, vector<4x1xi32>
    %50 = vector.broadcast %49 : vector<4x1xi32> to vector<4x128xi32>
    %51 = arith.cmpi eq, %0, %50 : vector<4x128xi32>
    %52 = arith.ori %48, %51 : vector<4x128xi1>
    %c0_14 = arith.constant 0 : index
    %c14 = arith.constant 14 : index
    %53 = vector.load %arg1[%c0_14, %c14] : memref<4x16xi32, #tpu.memory_space<vmem>>, vector<4x1xi32>
    %54 = vector.broadcast %53 : vector<4x1xi32> to vector<4x128xi32>
    %55 = arith.cmpi eq, %0, %54 : vector<4x128xi32>
    %56 = arith.ori %52, %55 : vector<4x128xi1>
    %c0_15 = arith.constant 0 : index
    %c15 = arith.constant 15 : index
    %57 = vector.load %arg1[%c0_15, %c15] : memref<4x16xi32, #tpu.memory_space<vmem>>, vector<4x1xi32>
    %58 = vector.broadcast %57 : vector<4x1xi32> to vector<4x128xi32>
    %59 = arith.cmpi eq, %0, %58 : vector<4x128xi32>
    %60 = arith.ori %56, %59 : vector<4x128xi1>
    %61 = tpu.concatenate %15, %30, %45, %60 in 1 : vector<4x128xi1>, vector<4x128xi1>, vector<4x128xi1>, vector<4x128xi1> -> vector<4x512xi1>
    %62 = arith.extui %61 : vector<4x512xi1> to vector<4x512xi32>
    %63 = arith.sitofp %62 : vector<4x512xi32> to vector<4x512xf32>
    %c0_16 = arith.constant 0 : index
    %c0_17 = arith.constant 0 : index
    %64 = vector.load %arg2[%c0_16, %c0_17] : memref<512x128xf32, #tpu.memory_space<vmem>>, vector<512x128xf32>
    %cst = arith.constant dense<0.000000e+00> : vector<4x128xf32>
    %65 = tpu.matmul %63, %64, %cst {dimension_numbers = #tpu.dot_dimension_numbers<[1], [0], [0], [1], [0, 0, 1, 1], [], []>} : vector<4x512xf32>, vector<512x128xf32>, vector<4x128xf32> -> vector<4x128xf32>
    %c0_18 = arith.constant 0 : index
    %c0_19 = arith.constant 0 : index
    %66 = vector.load %arg3[%c0_18, %c0_19] : memref<4x128xf32, #tpu.memory_space<vmem>>, vector<4x128xf32>
    tpu.vector_store %arg3[%c0_18, %c0_19], %65 {strides = array<i32>} : memref<4x128xf32, #tpu.memory_space<vmem>>, vector<4x128xf32>,
    return
  }
  func.func @transform_0(%arg0: i32) -> (i32, i32) {
    %c0_i32 = arith.constant 0 : i32
    %c0_i32_0 = arith.constant 0 : i32
    return %arg0, %c0_i32 : i32, i32
  }
  func.func @transform_1(%arg0: i32) -> (i32, i32) {
    %c0_i32 = arith.constant 0 : i32
    %c0_i32_0 = arith.constant 0 : i32
    %c0_i32_1 = arith.constant 0 : i32
    return %c0_i32, %c0_i32_0 : i32, i32
  }
  func.func @transform_2(%arg0: i32) -> (i32, i32) {
    %c0_i32 = arith.constant 0 : i32
    %c0_i32_0 = arith.constant 0 : i32
    return %arg0, %c0_i32 : i32, i32
  }
}

</mosaic_0001>

<bundles_post_ra>
// kernel: tpu_custom_call.1
= control target key start
LH: loop header
LB: loop body
LE: loop exit
PB: predicated region body
PF: predicated region fallthrough
CT: control target
= control target key end

     0   :  { %7 = vsyncpa [#allocation3], 0  ;;  %s472_s0 = inlined_call_operand.hbm [shape: s32[4,16], index: 0, kind: input, shape index: {}]   ;;  %s473_s1 = inlined_call_operand.hbm [shape: f32[512,128], index: 1, kind: input, shape index: {}]   ;;  %s474_s2 = inlined_call_operand.hbm [shape: f32[4,128], index: 2, kind: output, shape index: {}]  }
   0x1   :  { %8 = vsyncpa [#allocation6], 0 }
   0x2   :  { %9 = vsyncpa [#allocation4], 0  ;;  %s15_s11 = sshll.u32 %s472_s0, 4  ;;  %s417_s12 = smov [#allocation2]   ;;  %s16_s11 = int_to_ptr.hbm [resolvable:$true] %s15_s11 }
   0x3   :  { %s17_s13 = sshll.u32 %s417_s12, 4  ;;  %s25_s16 = sshll.u32 %s473_s1, 4  ;;  %s18_s13 = int_to_ptr.vmem [resolvable:$true] %s17_s13  ;;  %s26_s16 = int_to_ptr.hbm [resolvable:$true] %s25_s16 }
   0x4   :  { %20 = dma.hbm_to_vmem [thread:$0]  %s16_s11, 64, %s18_s13, [#allocation3]  }
   0x5   :  { %s418_s17 = smov [#allocation5]   ;;  %s419_s19 = smov 128  }
   0x6   :  { %s27_s18 = sshll.u32 %s418_s17, 4  ;;  %s420_s20 = smov 8   ;;  %s28_s18 = int_to_ptr.vmem [resolvable:$true] %s27_s18 }
   0x7   :  { %33 = dma.hbm_to_vmem [thread:$0]  %s26_s16, 8192, %s28_s18, [#allocation6], %s419_s19, %s419_s19, %s420_s20  }
   0x8   :  { %411 = dma.done.wait [#allocation3], 64  }
   0x9   :  { %412 = vsyncadd [#allocation3], 4294967232 }
   0xa   :  { %413 = dma.done.wait [#allocation6], 8192  }
   0xb   :  { %414 = vsyncadd [#allocation6], 4294959104  ;;  %v421_v0 = vmov 10   ;;  %v422_v1 = vmov 8   ;;  %v423_v2 = vmov 12   ;;  %v424_v4 = vmov 11  }
   0xc   :  { %324 = vset.pattern.permute.xlu1 %v421_v0  ;;  %322 = vset.pattern.permute.xlu0 %v422_v1  ;;  %v44_v3 = vld [vmem:[#allocation2] sm:$0xf]  ;;  %v425_v5 = vmov 9   ;;  %v426_v6 = vmov 13   ;;  %v175_v8 = vld [vmem:[#allocation5 + $0x170] sm:$0xff]  ;;  %v427_v9 = vmov 14  }
   0xd   :  { %326 = vset.pattern.permute.xlu2 %v423_v2  ;;  %93 = vperm.xlu1 %324, %v44_v3   ;;  %v176_v7 = vld [vmem:[#allocation5 + $0x178] sm:$0xff]  ;;  %v428_v10 = vmov 1   ;;  %v174_v11 = vld [vmem:[#allocation5 + $0x168] sm:$0xff]  ;;  %v429_v12 = vmov 0   ;;  %v430_v13 = vmov 4   ;;  %v431_v14 = vmov 6  }
   0xe   :  { %84 = vperm.xlu0 %322, %v44_v3   ;;  %103 = vperm.xlu2 %326, %v44_v3   ;;  %v432_v15 = vmov 5   ;;  %v433_v16 = vmov 15   ;;  %v434_v17 = vmov 2   ;;  %v435_v18 = vmov 3   ;;  %v173_v20 = vld [vmem:[#allocation5 + $0x160] sm:$0xff]  ;;  %v172_v21 = vld [vmem:[#allocation5 + $0x158] sm:$0xff] }
   0xf   :  { %233 = vmatpush.msra.mxu2 %v176_v7  ;;  %v436_v19 = vmov 7   ;;  %v171_v22 = vld [vmem:[#allocation5 + $0x150] sm:$0xff]  ;;  %v170_v23 = vld [vmem:[#allocation5 + $0x148] sm:$0xff]  ;;  %v169_v24 = vld [vmem:[#allocation5 + $0x140] sm:$0xff]  ;;  %s438_s0 = smov [#allocation7]   ;;  %s281_s23 = sshll.u32 %s474_s2, 4  ;;  %s282_s23 = int_to_ptr.hbm [resolvable:$true] %s281_s23 }
  0x10   :  { %v168_v25 = vld [vmem:[#allocation5 + $0x138] sm:$0xff]  ;;  %v167_v27 = vld [vmem:[#allocation5 + $0x130] sm:$0xff]  ;;  %v166_v29 = vld [vmem:[#allocation5 + $0x128] sm:$0xff]  ;;  %s279_s1 = sshll.u32 %s438_s0, 4  ;;  %s280_s1 = int_to_ptr.vmem [resolvable:$true] %s279_s1 }
  0x11   :  { %234 = vmatpush.msra.mxu2 %v175_v8  ;;  %v160_v26 = vld [vmem:[#allocation5 + $0xf8] sm:$0xff]  ;;  %v159_v28 = vld [vmem:[#allocation5 + $0xf0] sm:$0xff]  ;;  %v158_v30 = vld [vmem:[#allocation5 + $0xe8] sm:$0xff] }
  0x12   :  { %213 = vmatpush.msra.mxu1 %v160_v26  ;;  %v165_v31 = vld [vmem:[#allocation5 + $0x120] sm:$0xff]  ;;  %v192_v32 = vld [vmem:[#allocation5 + $0x1f8] sm:$0xff]  ;;  %v163_v36 = vld [vmem:[#allocation5 + $0x110] sm:$0xff]  ;;  %v437_v26 = vmov 1.0  }
  0x13   :  { %235 = vmatpush.msra.mxu2 %v174_v11  ;;  %v157_v33 = vld [vmem:[#allocation5 + $0xe0] sm:$0xff]  ;;  %v164_v34 = vld [vmem:[#allocation5 + $0x118] sm:$0xff]  ;;  %253 = vmatpush.msra.mxu3 %v192_v32  ;;  %v191_v38 = vld [vmem:[#allocation5 + $0x1f0] sm:$0xff] }
  0x14   :  { %214 = vmatpush.msra.mxu1 %v159_v28  ;;  %v156_v35 = vld [vmem:[#allocation5 + $0xd8] sm:$0xff]  ;;  %v155_v39 = vld [vmem:[#allocation5 + $0xd0] sm:$0xff]  ;;  %v162_v40 = vld [vmem:[#allocation5 + $0x108] sm:$0xff] }
  0x15   :  { %325 = vset.pattern.permute.xlu1 %v424_v4  ;;  %236 = vmatpush.msra.mxu2 %v173_v20  ;;  %v190_v41 = vld [vmem:[#allocation5 + $0x1e8] sm:$0xff]  ;;  %v161_v43 = vld [vmem:[#allocation5 + $0x100] sm:$0xff]  ;;  %v188_v46 = vld [vmem:[#allocation5 + $0x1d8] sm:$0xff] }
  0x16   :  { %323 = vset.pattern.permute.xlu0 %v425_v5  ;;  %98 = vperm.xlu1 %325, %v44_v3   ;;  %v154_v42 = vld [vmem:[#allocation5 + $0xc8] sm:$0xff]  ;;  %v189_v44 = vld [vmem:[#allocation5 + $0x1e0] sm:$0xff]  ;;  %v144_v47 = vld [vmem:[#allocation5 + $0x78] sm:$0xff] }
  0x17   :  { %88 = vperm.xlu0 %323, %v44_v3   ;;  %327 = vset.pattern.permute.xlu2 %v426_v6  ;;  %v153_v45 = vld [vmem:[#allocation5 + $0xc0] sm:$0xff]  ;;  %v152_v48 = vld [vmem:[#allocation5 + $0xb8] sm:$0xff]  ;;  %v187_v49 = vld [vmem:[#allocation5 + $0x1d0] sm:$0xff] }
  0x18   :  { %107 = vperm.xlu2 %327, %v44_v3   ;;  %237 = vmatpush.msra.mxu2 %v172_v21  ;;  %v143_v51 = vld [vmem:[#allocation5 + $0x70] sm:$0xff]  ;;  %v186_v53 = vld [vmem:[#allocation5 + $0x1c8] sm:$0xff]  ;;  %v185_v56 = vld [vmem:[#allocation5 + $0x1c0] sm:$0xff] }
  0x19   :  { %215 = vmatpush.msra.mxu1 %v158_v30  ;;  %254 = vmatpush.msra.mxu3 %v191_v38  ;;  %v151_v52 = vld [vmem:[#allocation5 + $0xb0] sm:$0xff]  ;;  %v142_v54 = vld [vmem:[#allocation5 + $0x68] sm:$0xff]  ;;  %v141_v57 = vld [vmem:[#allocation5 + $0x60] sm:$0xff] }
  0x1a   :  { %238 = vmatpush.msra.mxu2 %v171_v22  ;;  %193 = vmatpush.msra.mxu0 %v144_v47  ;;  %v150_v55 = vld [vmem:[#allocation5 + $0xa8] sm:$0xff]  ;;  %v149_v58 = vld [vmem:[#allocation5 + $0xa0] sm:$0xff]  ;;  %v184_v59 = vld [vmem:[#allocation5 + $0x1b8] sm:$0xff] }
  0x1b   :  { %216 = vmatpush.msra.mxu1 %v157_v33  ;;  %255 = vmatpush.msra.mxu3 %v190_v41  ;;  %v140_v60 = vld [vmem:[#allocation5 + $0x58] sm:$0xff]  ;;  %v183_v62 = vld [vmem:[#allocation5 + $0x1b0] sm:$0xff]  ;;  %v182_v1 = vld [vmem:[#allocation5 + $0x1a8] sm:$0xff] }
  0x1c   :  { %239 = vmatpush.msra.mxu2 %v170_v23  ;;  %194 = vmatpush.msra.mxu0 %v143_v51  ;;  %v148_v61 = vld [vmem:[#allocation5 + $0x98] sm:$0xff]  ;;  %v139_v63 = vld [vmem:[#allocation5 + $0x50] sm:$0xff]  ;;  %v146_v4 = vld [vmem:[#allocation5 + $0x88] sm:$0xff] }
  0x1d   :  { %217 = vmatpush.msra.mxu1 %v156_v35  ;;  %256 = vmatpush.msra.mxu3 %v189_v44  ;;  %v147_v0 = vld [vmem:[#allocation5 + $0x90] sm:$0xff]  ;;  %v181_v5 = vld [vmem:[#allocation5 + $0x1a0] sm:$0xff]  ;;  %v136_v11 = vld [vmem:[#allocation5 + $0x38] sm:$0xff] }
  0x1e   :  { %328 = vset.pattern.permute.xlu1 %v427_v9  ;;  %240 = vmatpush.msra.mxu2 %v169_v24  ;;  %v137_v6 = vld [vmem:[#allocation5 + $0x40] sm:$0xff]  ;;  %v132_v21 = vld [vmem:[#allocation5 + $0x18] sm:$0xff]  ;;  %v131_v24 = vld [vmem:[#allocation5 + $0x10] sm:$0xff] }
  0x1f   :  { %330 = vset.pattern.permute.xlu0 %v428_v10  ;;  %112 = vperm.xlu1 %328, %v44_v3   ;;  %v145_v7 = vld [vmem:[#allocation5 + $0x80] sm:$0xff]  ;;  %v180_v10 = vld [vmem:[#allocation5 + $0x198] sm:$0xff] }
  0x20   :  { %50 = vperm.xlu0 %330, %v44_v3   ;;  %329 = vset.pattern.permute.xlu2 %v429_v12  ;;  %v179_v12 = vld [vmem:[#allocation5 + $0x190] sm:$0xff] }
  0x21   :  { %46 = vperm.xlu2 %329, %v44_v3   ;;  %241 = vmatpush.msra.mxu2 %v168_v25  ;;  %v130_v25 = vld [vmem:[#allocation5 + $0x8] sm:$0xff] }
  0x22   :  { %218 = vmatpush.msra.mxu1 %v155_v39  ;;  %257 = vmatpush.msra.mxu3 %v188_v46 }
  0x23   :  { %242 = vmatpush.msra.mxu2 %v167_v27  ;;  %195 = vmatpush.msra.mxu0 %v142_v54  ;;  %v129_v27 = vld [vmem:[#allocation5] sm:$0xff] }
  0x24   :  { %219 = vmatpush.msra.mxu1 %v154_v42  ;;  %258 = vmatpush.msra.mxu3 %v187_v49 }
  0x25   :  { %243 = vmatpush.msra.mxu2 %v166_v29  ;;  %196 = vmatpush.msra.mxu0 %v141_v57 }
  0x26   :  { %220 = vmatpush.msra.mxu1 %v153_v45  ;;  %259 = vmatpush.msra.mxu3 %v186_v53 }
  0x27   :  { %331 = vset.pattern.permute.xlu1 %v430_v13  ;;  %244 = vmatpush.msra.mxu2 %v165_v31  ;;  %v135_v13 = vld [vmem:[#allocation5 + $0x30] sm:$0xff] }
  0x28   :  { %335 = vset.pattern.permute.xlu0 %v431_v14  ;;  %65 = vperm.xlu1 %331, %v44_v3   ;;  %v42_v14 = vlaneseq }
  0x29   :  { %74 = vperm.xlu0 %335, %v44_v3   ;;  %332 = vset.pattern.permute.xlu2 %v432_v15  ;;  %v178_v15 = vld [vmem:[#allocation5 + $0x188] sm:$0xff] }
  0x2a   :  { %69 = vperm.xlu2 %332, %v44_v3   ;;  %245 = vmatpush.msra.mxu2 %v164_v34 }
  0x2b   :  { %221 = vmatpush.msra.mxu1 %v152_v48  ;;  %260 = vmatpush.msra.mxu3 %v185_v56 }
  0x2c   :  { %246 = vmatpush.msra.mxu2 %v163_v36  ;;  %197 = vmatpush.msra.mxu0 %v140_v60 }
  0x2d   :  { %222 = vmatpush.msra.mxu1 %v151_v52  ;;  %261 = vmatpush.msra.mxu3 %v184_v59 }
  0x2e   :  { %247 = vmatpush.msra.mxu2 %v162_v40  ;;  %198 = vmatpush.msra.mxu0 %v139_v63 }
  0x2f   :  { %223 = vmatpush.msra.mxu1 %v150_v55  ;;  %262 = vmatpush.msra.mxu3 %v183_v62 }
  0x30   :  { %333 = vset.pattern.permute.xlu1 %v433_v16  ;;  %248 = vmatpush.msra.mxu2 %v161_v43 }
  0x31   :  { %338 = vset.pattern.permute.xlu0 %v433_v16  ;;  %117 = vperm.xlu1 %333, %v44_v3   ;;  %v134_v16 = vld [vmem:[#allocation5 + $0x28] sm:$0xff] }
  0x32   :  { %334 = vset.pattern.permute.xlu2 %v434_v17  ;;  %224 = vmatpush.msra.mxu1 %v149_v58  ;;  %v43_v17 = vand.u32 127, %v42_v14 }
  0x33   :  { %55 = vperm.xlu2 %334, %v44_v3   ;;  %263 = vmatpush.msra.mxu3 %v182_v1 }
  0x34   :  { %225 = vmatpush.msra.mxu1 %v148_v61 }
  0x35   :  { %264 = vmatpush.msra.mxu3 %v181_v5 }
  0x36   :  { %226 = vmatpush.msra.mxu1 %v147_v0 }
  0x37   :  { %265 = vmatpush.msra.mxu3 %v180_v10 }
  0x38   :  { %227 = vmatpush.msra.mxu1 %v146_v4 }
  0x39   :  { %336 = vset.pattern.permute.xlu1 %v435_v18  ;;  %266 = vmatpush.msra.mxu3 %v179_v12  ;;  %v177_v18 = vld [vmem:[#allocation5 + $0x180] sm:$0xff] }
  0x3a   :  { %60 = vperm.xlu1 %336, %v44_v3   ;;  %228 = vmatpush.msra.mxu1 %v145_v7 }
  0x3b   :  { %337 = vset.pattern.permute.xlu2 %v436_v19  ;;  %267 = vmatpush.msra.mxu3 %v178_v15  ;;  %v133_v19 = vld [vmem:[#allocation5 + $0x20] sm:$0xff] }
  0x3c   :  { %79 = vperm.xlu2 %337, %v44_v3   ;;  %v138_v3 = vld [vmem:[#allocation5 + $0x48] sm:$0xff] }
  0x3d   :  { %199 = vmatpush.msra.mxu0 %v138_v3  ;;  %268 = vmatpush.msra.mxu3 %v177_v18 }
  0x3f   :  { %200 = vmatpush.msra.mxu0 %v137_v6 }
  0x41   :  { %201 = vmatpush.msra.mxu0 %v136_v11 }
  0x43   :  { %202 = vmatpush.msra.mxu0 %v135_v13 }
  0x45   :  { %203 = vmatpush.msra.mxu0 %v134_v16 }
  0x47   :  { %204 = vmatpush.msra.mxu0 %v133_v19 }
  0x49   :  { %205 = vmatpush.msra.mxu0 %v132_v21 }
  0x4b   :  { %206 = vmatpush.msra.mxu0 %v131_v24 }
  0x4d   :  { %207 = vmatpush.msra.mxu0 %v130_v25 }
  0x4f   :  { %208 = vmatpush.msra.mxu0 %v129_v27 }
  0x68   :  { %v460_v37 = vpop.permute.xlu2 %103 }
  0x69   :  { %vm105_vm14 = vcmp.eq.s32.totalorder %v43_v17, %v460_v37 }
  0x72   :  { %v462_v50 = vpop.permute.xlu2 %107 }
  0x73   :  { %vm109_vm15 = vcmp.eq.s32.totalorder %v43_v17, %v462_v50 }
  0x7b   :  { %v464_v2 = vpop.permute.xlu2 %46 }
  0x7f   :  { %v94_v8 = vpop.permute.xlu1 %93 }
  0x80   :  { %v85_v9 = vpop.permute.xlu0 %84  ;;  %vm95_vm2 = vcmp.eq.s32.totalorder %v43_v17, %v94_v8 }
  0x81   :  { %vm86_vm0 = vcmp.eq.s32.totalorder %v43_v17, %v85_v9 }
  0x84   :  { %v70_v20 = vpop.permute.xlu2 %69 }
  0x85   :  { %vm71_vm7 = vcmp.eq.s32.totalorder %v43_v17, %v70_v20 }
  0x88   :  { %v99_v22 = vpop.permute.xlu1 %98 }
  0x89   :  { %v89_v23 = vpop.permute.xlu0 %88  ;;  %vm100_vm4 = vcmp.eq.s32.totalorder %v43_v17, %v99_v22 }
  0x8a   :  { %vm90_vm1 = vcmp.eq.s32.totalorder %v43_v17, %v89_v23 }
  0x8b   :  { %vm91_vm3 = vmor %vm86_vm0, %vm90_vm1 }
  0x8c   :  { %vm96_vm5 = vmor %vm91_vm3, %vm95_vm2 }
  0x8d   :  { %vm101_vm6 = vmor %vm96_vm5, %vm100_vm4  ;;  %v56_v28 = vpop.permute.xlu2 %55  ;;  %vm48_vm5 = vcmp.eq.s32.totalorder %v43_v17, %v464_v2 }
  0x8e   :  { %298 = vmatmul.msk.f32.vlgmr.msra.gmra.mxu2 %vm101_vm6, %v437_v26  ;;  %vm110_vm1 = vmor %vm105_vm14, %vm109_vm15 }
  0x91   :  { %v113_v29 = vpop.permute.xlu1 %112 }
  0x92   :  { %v51_v30 = vpop.permute.xlu0 %50  ;;  %vm114_vm0 = vcmp.eq.s32.totalorder %v43_v17, %v113_v29 }
  0x93   :  { %vm115_vm2 = vmor %vm110_vm1, %vm114_vm0  ;;  %vm52_vm6 = vcmp.eq.s32.totalorder %v43_v17, %v51_v30 }
  0x96   :  { %v80_v31 = vpop.permute.xlu2 %79 }
  0x97   :  { %vm81_vm10 = vcmp.eq.s32.totalorder %v43_v17, %v80_v31 }
  0x9a   :  { %v66_v32 = vpop.permute.xlu1 %65 }
  0x9b   :  { %v75_v33 = vpop.permute.xlu0 %74  ;;  %vm67_vm8 = vcmp.eq.s32.totalorder %v43_v17, %v66_v32 }
  0x9c   :  { %vm76_vm9 = vcmp.eq.s32.totalorder %v43_v17, %v75_v33  ;;  %vm72_vm11 = vmor %vm67_vm8, %vm71_vm7  ;;  %vm57_vm8 = vcmp.eq.s32.totalorder %v43_v17, %v56_v28 }
  0x9d   :  { %vm77_vm12 = vmor %vm72_vm11, %vm76_vm9 }
  0x9e   :  { %vm82_vm13 = vmor %vm77_vm12, %vm81_vm10 }
  0x9f   :  { %297 = vmatmul.msk.f32.vlgmr.msra.gmra.mxu1 %vm82_vm13, %v437_v26  ;;  %vm53_vm7 = vmor %vm48_vm5, %vm52_vm6 }
  0xa0   :  { %vm58_vm9 = vmor %vm53_vm7, %vm57_vm8 }
  0xa3   :  { %v118_v34 = vpop.permute.xlu1 %117 }
  0xa4   :  { %vm119_vm3 = vcmp.eq.s32.totalorder %v43_v17, %v118_v34 }
  0xa5   :  { %vm120_vm4 = vmor %vm115_vm2, %vm119_vm3 }
  0xa6   :  { %299 = vmatmul.msk.f32.vlgmr.msra.gmra.mxu3 %vm120_vm4, %v437_v26 }
  0xac   :  { %v61_v35 = vpop.permute.xlu1 %60 }
  0xad   :  { %vm62_vm10 = vcmp.eq.s32.totalorder %v43_v17, %v61_v35 }
  0xae   :  { %vm63_vm11 = vmor %vm58_vm9, %vm62_vm10 }
  0xaf   :  { %296 = vmatmul.msk.f32.vlgmr.msra.gmra.mxu0 %vm63_vm11, %v437_v26 }
 0x111   :  { %v250_v39 = vpop.f32.mrf.mxu2 }
 0x11c   :  { %v230_v36 = vpop.f32.mrf.mxu1 }
 0x129   :  { %v270_v41 = vpop.f32.mrf.mxu3 }
 0x12c   :  { %v210_v37 = vpop.f32.mrf.mxu0 }
 0x12d   :  { %v231_v38 = vadd.f32 %v230_v36, %v210_v37 }
 0x12f   :  { %v251_v40 = vadd.f32 %v250_v39, %v231_v38 }
 0x131   :  { %v271_v42 = vadd.f32 %v270_v41, %v251_v40 }
 0x133   :  { %273 = vst [vmem:[#allocation7] sm:$0xf] %v271_v42 }
 0x134   :  { %284 = dma.vmem_to_hbm [thread:$0]  %s280_s1, 64, %s282_s23, [#allocation4]  }
 0x135   :  { %415 = dma.done.wait [#allocation4], 64  }
 0x136   :  { %416 = vsyncadd [#allocation4], 4294967232 }
 0x137   :  { %289 = vsyncpa [#allocation3], 1 }
 0x138   :  { %290 = vsyncpa [#allocation6], 1 }
 0x139   :  { %291 = vsyncpa [#allocation4], 1 }

</bundles_post_ra>
